<compile_context>
chip_gen: v5e
topology: v5e:2x2
jax: 0.10.0
libtpu: 0.0.40
codegen_flags: <defaults>
</compile_context>

<pallas_src>
import functools

import jax
import jax.numpy as jnp
from jax.experimental import pallas as pl
from jax.experimental.pallas import tpu as pltpu

LANES = 128
SUBLANES = 8
ACC_ROWS = 64                      # rows of the per-core resident accumulator
BLOCK_BYTES_PER_INPUT = 4 << 20    # ~4 MiB per input block, any dtype
VMEM_LIMIT_BYTES = 32 << 20        # 2 inputs x 2 bufs x 4 MiB = 16 MiB + headroom
SMALL_INPUT_BYTES = 256 << 10      # below this, plain jnp beats kernel overhead


def _round_up(n: int, m: int) -> int:
    return ((n + m - 1) // m) * m


def _get_outnorm(shape, out_norm: str = "") -> float:
    if not out_norm:
        return 1.0
    norm = 1.0
    if "b" in out_norm:
        norm /= shape[0]
    if "c" in out_norm:
        norm /= shape[-3]
    if "i" in out_norm:
        norm /= shape[-1] * shape[-2]
    return norm


def _num_tensorcores() -> int:
    """2 TensorCores per chip on v7x; 1 on v5e/v6e (and as a safe default)."""
    try:
        kind = jax.devices()[0].device_kind.lower()
    except Exception:
        return 1
    return 2 if "v7" in kind else 1


def _charbonnier_kernel(x_ref, y_ref, o_ref, *, eps2, n_rows, block_rows,
                        num_blocks, acc_rows):
    # Grid = (num_cores, blocks_per_core); global block id for this step:
    i = pl.program_id(1)
    g = pl.program_id(0) * pl.num_programs(1) + i

    # Zero this core's resident (acc_rows, 128) accumulator at sweep start.
    @pl.when(i == 0)
    def _():
        o_ref[...] = jnp.zeros_like(o_ref)

    # Stream in native dtype; cast to f32 on the VPU (free — kernel is HBM-bound).
    d = x_ref[...].astype(jnp.float32) - y_ref[...].astype(jnp.float32)
    val = jnp.sqrt(d * d + jnp.float32(eps2))

    groups = block_rows // acc_rows
    is_full = g < (num_blocks - 1)

    # Steady state: no masking work; wide accumulator gives the VPU ILP so the
    # reduce hides under the block DMA.
    @pl.when(is_full)
    def _():
        o_ref[...] += jnp.sum(val.reshape(groups, acc_rows, LANES), axis=0)

    # Last block (ragged rows) and phantom blocks (uneven core split) only.
    # NOTE: jnp.where is a true select applied AFTER the sqrt, so NaN/Inf in
    # Pallas-padded rows never propagates (do not switch to multiply-by-mask).
    @pl.when(jnp.logical_not(is_full))
    def _():
        valid_rows = n_rows - g * block_rows          # may be <= 0 (phantom)
        row_ids = jax.lax.broadcasted_iota(jnp.int32, val.shape, 0)
        masked = jnp.where(row_ids < valid_rows, val, jnp.float32(0.0))
        o_ref[...] += jnp.sum(masked.reshape(groups, acc_rows, LANES), axis=0)


def charbonnier_loss(x, y, eps: float = 1e-6, out_norm: str = "bci",
                     num_cores: int | None = None, force_pallas: bool = False):
    """sum(sqrt((x-y)^2 + eps^2)) * norm, hot path in Pallas."""
    assert x.shape == y.shape, (x.shape, y.shape)
    total = int(x.size)
    eps2 = float(eps) * float(eps)
    norm = _get_outnorm(x.shape, out_norm)
    itemsize = jnp.dtype(x.dtype).itemsize

    if total == 0:
        return jnp.float32(0.0)

    xf = x.reshape(-1)
    yf = y.reshape(-1)

    # Small-input fallback: launch + grid prologue dominates for tiny tensors.
    if not force_pallas and total * itemsize < SMALL_INPUT_BYTES:
        d = xf.astype(jnp.float32) - yf.astype(jnp.float32)
        s = jnp.sum(jnp.sqrt(d * d + jnp.float32(eps2)))
        return (s * jnp.float32(norm)).astype(jnp.float32)

    rem = total % LANES          # ragged tail (<128 elems) handled outside
    main = total - rem
    n_rows = main // LANES

    partial_sums = []

    if n_rows > 0:
        # Lane-dense slab in the NATIVE dtype (no pad / no upcast copies).
        if rem:
            x2 = xf[:main].reshape(n_rows, LANES)
            y2 = yf[:main].reshape(n_rows, LANES)
        else:
            x2 = xf.reshape(n_rows, LANES)
            y2 = yf.reshape(n_rows, LANES)

        # Block sublane dim must respect packed-dtype tiling (8 for 32-bit,
        # 16 for bf16, 32 for 8-bit).
        row_align = SUBLANES * max(1, 4 // max(1, itemsize))

        # Byte-budget block: ~4 MiB per input regardless of dtype.
        target_rows = max(row_align, BLOCK_BYTES_PER_INPUT // (LANES * itemsize))
        target_rows = _round_up(target_rows, max(ACC_ROWS, row_align))
        align = max(ACC_ROWS, row_align) if n_rows >= ACC_ROWS else row_align
        br = min(target_rows, _round_up(n_rows, align))
        # Accumulator rows: 64 in steady state, smaller only for tiny inputs.
        acc_rows = next(c for c in (64, 32, 16, 8) if br % c == 0)

        num_blocks = pl.cdiv(n_rows, br)
        if num_cores is None:
            num_cores = _num_tensorcores()
        num_cores = max(1, min(num_cores, num_blocks))   # no phantom-only cores
        bpc = pl.cdiv(num_blocks, num_cores)             # blocks per core

        def in_map(c, i):
            # Phantom blocks (uneven core split) are clamped to a valid block;
            # their contribution is masked to 0 in-kernel.
            return (jnp.minimum(c * bpc + i, num_blocks - 1), 0)

        kernel = functools.partial(
            _charbonnier_kernel, eps2=eps2, n_rows=n_rows, block_rows=br,
            num_blocks=num_blocks, acc_rows=acc_rows)

        cost = pl.CostEstimate(
            flops=3 * main,                 # sub, mul, add per element
            transcendentals=main,           # sqrt per element
            bytes_accessed=2 * main * itemsize
            + num_cores * acc_rows * LANES * 4)

        # TODO(synk): on v7x, confirm in a trace that the leading "parallel"
        # axis actually shards across both TensorCores; if not, switch that
        # axis to pltpu.CORE_PARALLEL.
        acc = pl.pallas_call(
            kernel,
            out_shape=jax.ShapeDtypeStruct((num_cores * acc_rows, LANES),
                                           jnp.float32),
            grid_spec=pltpu.PrefetchScalarGridSpec(
                num_scalar_prefetch=0,
                grid=(num_cores, bpc),
                in_specs=[
                    pl.BlockSpec((br, LANES), in_map),
                    pl.BlockSpec((br, LANES), in_map),
                ],
                out_specs=pl.BlockSpec((acc_rows, LANES), lambda c, i: (c, 0)),
            ),
            compiler_params=pltpu.CompilerParams(
                dimension_semantics=("parallel", "arbitrary"),
                vmem_limit_bytes=VMEM_LIMIT_BYTES),
            cost_estimate=cost,
        )(x2, y2)
        partial_sums.append(jnp.sum(acc))

    if rem:
        # Tiny scalar fix-up for the <128-element tail.
        dt = xf[main:].astype(jnp.float32) - yf[main:].astype(jnp.float32)
        partial_sums.append(jnp.sum(jnp.sqrt(dt * dt + jnp.float32(eps2))))

    total_sum = partial_sums[0]
    for p in partial_sums[1:]:
        total_sum = total_sum + p

    return (total_sum * jnp.float32(norm)).astype(jnp.float32)


def _reference(x, y, eps=1e-6, out_norm="bci"):
    norm = _get_outnorm(x.shape, out_norm)
    xf = x.astype(jnp.float32)
    yf = y.astype(jnp.float32)
    return jnp.sum(jnp.sqrt((xf - yf) ** 2 + eps ** 2)) * norm


if __name__ == "__main__":
    key = jax.random.PRNGKey(0)
    kx, ky = jax.random.split(key)

    # 1) NCHW small shape (as the PyTorch module expects); force the Pallas path.
    x = jax.random.normal(kx, (2, 4, 16, 16), dtype=jnp.float32)
    y = jax.random.normal(ky, (2, 4, 16, 16), dtype=jnp.float32)
    loss = charbonnier_loss(x, y, eps=1e-6, out_norm="bci", force_pallas=True)
    jax.block_until_ready(loss)
    ref = _reference(x, y, eps=1e-6, out_norm="bci")
    assert jnp.allclose(loss, ref, rtol=1e-5, atol=1e-6), (loss, ref)

    # 2) Ragged bf16 case: native-dtype streaming, masked last block,
    #    <128-element tail fix-up.
    kx2, ky2 = jax.random.split(ky)
    x2 = jax.random.normal(kx2, (1, 3, 17, 19), dtype=jnp.bfloat16)
    y2 = jax.random.normal(ky2, (1, 3, 17, 19), dtype=jnp.bfloat16)
    loss2 = charbonnier_loss(x2, y2, eps=1e-6, out_norm="bci", force_pallas=True)
    jax.block_until_ready(loss2)
    ref2 = _reference(x2, y2, eps=1e-6, out_norm="bci")
    assert jnp.allclose(loss2, ref2, rtol=1e-4, atol=1e-5), (loss2, ref2)

    # 3) Default small-input fallback path (no Pallas) stays correct.
    loss3 = charbonnier_loss(x, y, eps=1e-6, out_norm="bci")
    jax.block_until_ready(loss3)
    assert jnp.allclose(loss3, ref, rtol=1e-5, atol=1e-6), (loss3, ref)

    # 4) Multi-block case: exercises steady-state (unmasked) blocks and the
    #    cross-step accumulation into the resident (64,128) block.
    kx3, ky3 = jax.random.split(kx2)
    x4 = jax.random.normal(kx3, (2, 4, 512, 512), dtype=jnp.float32)
    y4 = jax.random.normal(ky3, (2, 4, 512, 512), dtype=jnp.float32)
    loss4 = charbonnier_loss(x4, y4, eps=1e-6, out_norm="bci")
    jax.block_until_ready(loss4)
    ref4 = _reference(x4, y4, eps=1e-6, out_norm="bci")
    assert jnp.allclose(loss4, ref4, rtol=1e-4, atol=1e-4), (loss4, ref4)

    print("KERNEL_OK")
</pallas_src>

<mosaic_0001>
module attributes {stable_mosaic.version = 11 : i64} {
  func.func @_charbonnier_kernel(%arg0: i32, %arg1: i32, %arg2: memref<16x128xf32, #tpu.memory_space<vmem>>, %arg3: memref<16x128xf32, #tpu.memory_space<vmem>>, %arg4: memref<16x128xf32, #tpu.memory_space<vmem>>) attributes {dimension_semantics = [#tpu.dimension_semantics<parallel>, #tpu.dimension_semantics<arbitrary>], iteration_bounds = array<i64: 1, 1>, scalar_prefetch = 0 : i64, scratch_operands = 0 : i64, tpu.core_type = #tpu.core_type<tc>, window_params = [{transform_indices = @transform_0, window_bounds = array<i64: 16, 128>}, {transform_indices = @transform_1, window_bounds = array<i64: 16, 128>}, {transform_indices = @transform_2, window_bounds = array<i64: 16, 128>}]} {
    %c1_i32 = arith.constant 1 : i32
    %0 = arith.muli %arg0, %c1_i32 : i32
    %1 = arith.addi %0, %arg1 : i32
    %c0_i32 = arith.constant 0 : i32
    %2 = arith.cmpi eq, %arg1, %c0_i32 : i32
    %3 = arith.extui %2 : i1 to i32
    %c0_i32_0 = arith.constant 0 : i32
    %4 = arith.cmpi ne, %3, %c0_i32_0 : i32
    scf.if %4 {
      %cst_7 = arith.constant 0.000000e+00 : f32
      %18 = vector.broadcast %cst_7 : f32 to vector<16x128xf32>
      %c0_8 = arith.constant 0 : index
      %c0_9 = arith.constant 0 : index
      %19 = vector.load %arg4[%c0_8, %c0_9] : memref<16x128xf32, #tpu.memory_space<vmem>>, vector<16x128xf32>
      tpu.vector_store %arg4[%c0_8, %c0_9], %18 {strides = array<i32>} : memref<16x128xf32, #tpu.memory_space<vmem>>, vector<16x128xf32>,
    } else {
    }
    %c0 = arith.constant 0 : index
    %c0_1 = arith.constant 0 : index
    %5 = vector.load %arg2[%c0, %c0_1] : memref<16x128xf32, #tpu.memory_space<vmem>>, vector<16x128xf32>
    %c0_2 = arith.constant 0 : index
    %c0_3 = arith.constant 0 : index
    %6 = vector.load %arg3[%c0_2, %c0_3] : memref<16x128xf32, #tpu.memory_space<vmem>>, vector<16x128xf32>
    %7 = arith.subf %5, %6 : vector<16x128xf32>
    %8 = arith.mulf %7, %7 : vector<16x128xf32>
    %cst = arith.constant 9.99999996E-13 : f32
    %9 = vector.broadcast %cst : f32 to vector<16x128xf32>
    %10 = arith.addf %8, %9 : vector<16x128xf32>
    %11 = math.sqrt %10 : vector<16x128xf32>
    %c0_i32_4 = arith.constant 0 : i32
    %12 = arith.cmpi slt, %1, %c0_i32_4 : i32
    %13 = arith.extui %12 : i1 to i32
    %c0_i32_5 = arith.constant 0 : i32
    %14 = arith.cmpi ne, %13, %c0_i32_5 : i32
    scf.if %14 {
      %c0_7 = arith.constant 0 : index
      %c0_8 = arith.constant 0 : index
      %18 = vector.load %arg4[%c0_7, %c0_8] : memref<16x128xf32, #tpu.memory_space<vmem>>, vector<16x128xf32>
      %19 = vector.shape_cast %11 : vector<16x128xf32> to vector<1x16x128xf32>
      %cst_9 = arith.constant dense<0.000000e+00> : vector<16x128xf32>
      %20 = vector.multi_reduction <add>, %19, %cst_9 [0] : vector<1x16x128xf32> to vector<16x128xf32>
      %21 = arith.addf %18, %20 : vector<16x128xf32>
      %c0_10 = arith.constant 0 : index
      %c0_11 = arith.constant 0 : index
      %22 = vector.load %arg4[%c0_10, %c0_11] : memref<16x128xf32, #tpu.memory_space<vmem>>, vector<16x128xf32>
      tpu.vector_store %arg4[%c0_10, %c0_11], %21 {strides = array<i32>} : memref<16x128xf32, #tpu.memory_space<vmem>>, vector<16x128xf32>,
    } else {
    }
    %true = arith.constant true
    %15 = arith.xori %12, %true : i1
    %16 = arith.extui %15 : i1 to i32
    %c0_i32_6 = arith.constant 0 : i32
    %17 = arith.cmpi ne, %16, %c0_i32_6 : i32
    scf.if %17 {
      %c16_i32 = arith.constant 16 : i32
      %18 = arith.muli %1, %c16_i32 : i32
      %c16_i32_7 = arith.constant 16 : i32
      %19 = arith.subi %c16_i32_7, %18 : i32
      %20 = tpu.iota {dimensions = array<i32: 0>} : vector<16x128xi32>
      %21 = vector.broadcast %19 : i32 to vector<16x128xi32>
      %22 = arith.cmpi slt, %20, %21 : vector<16x128xi32>
      %cst_8 = arith.constant 0.000000e+00 : f32
      %23 = vector.broadcast %cst_8 : f32 to vector<16x128xf32>
      %24 = arith.select %22, %11, %23 : vector<16x128xi1>, vector<16x128xf32>
      %c0_9 = arith.constant 0 : index
      %c0_10 = arith.constant 0 : index
      %25 = vector.load %arg4[%c0_9, %c0_10] : memref<16x128xf32, #tpu.memory_space<vmem>>, vector<16x128xf32>
      %26 = vector.shape_cast %24 : vector<16x128xf32> to vector<1x16x128xf32>
      %cst_11 = arith.constant dense<0.000000e+00> : vector<16x128xf32>
      %27 = vector.multi_reduction <add>, %26, %cst_11 [0] : vector<1x16x128xf32> to vector<16x128xf32>
      %28 = arith.addf %25, %27 : vector<16x128xf32>
      %c0_12 = arith.constant 0 : index
      %c0_13 = arith.constant 0 : index
      %29 = vector.load %arg4[%c0_12, %c0_13] : memref<16x128xf32, #tpu.memory_space<vmem>>, vector<16x128xf32>
      tpu.vector_store %arg4[%c0_12, %c0_13], %28 {strides = array<i32>} : memref<16x128xf32, #tpu.memory_space<vmem>>, vector<16x128xf32>,
    } else {
    }
    return
  }
  func.func @transform_0(%arg0: i32, %arg1: i32) -> (i32, i32) {
    %c1_i32 = arith.constant 1 : i32
    %0 = arith.muli %arg0, %c1_i32 : i32
    %1 = arith.addi %0, %arg1 : i32
    %c0_i32 = arith.constant 0 : i32
    %2 = arith.minsi %1, %c0_i32 : i32
    %c0_i32_0 = arith.constant 0 : i32
    %c0_i32_1 = arith.constant 0 : i32
    return %2, %c0_i32_0 : i32, i32
  }
  func.func @transform_1(%arg0: i32, %arg1: i32) -> (i32, i32) {
    %c1_i32 = arith.constant 1 : i32
    %0 = arith.muli %arg0, %c1_i32 : i32
    %1 = arith.addi %0, %arg1 : i32
    %c0_i32 = arith.constant 0 : i32
    %2 = arith.minsi %1, %c0_i32 : i32
    %c0_i32_0 = arith.constant 0 : i32
    %c0_i32_1 = arith.constant 0 : i32
    return %2, %c0_i32_0 : i32, i32
  }
  func.func @transform_2(%arg0: i32, %arg1: i32) -> (i32, i32) {
    %c0_i32 = arith.constant 0 : i32
    %c0_i32_0 = arith.constant 0 : i32
    return %arg0, %c0_i32 : i32, i32
  }
}

</mosaic_0001>

<bundles_post_ra>
// kernel: tpu_custom_call.1
= control target key start
LH: loop header
LB: loop body
LE: loop exit
PB: predicated region body
PF: predicated region fallthrough
CT: control target
= control target key end

     0   :  { %7 = vsyncpa [#allocation3], 0  ;;  %s289_s0 = inlined_call_operand.hbm [shape: f32[16,128], index: 0, kind: input, shape index: {}]   ;;  %s290_s1 = inlined_call_operand.hbm [shape: f32[16,128], index: 1, kind: input, shape index: {}]   ;;  %s291_s2 = inlined_call_operand.hbm [shape: f32[16,128], index: 2, kind: output, shape index: {}]  }
   0x1   :  { %8 = vsyncpa [#allocation6], 0 }
   0x2   :  { %9 = vsyncpa [#allocation4], 0  ;;  %s20_s11 = sshll.u32 %s289_s0, 4  ;;  %s251_s12 = smov [#allocation2]   ;;  %s21_s11 = int_to_ptr.hbm [resolvable:$true] %s20_s11 }
   0x3   :  { %s22_s13 = sshll.u32 %s251_s12, 4  ;;  %s39_s16 = sshll.u32 %s290_s1, 4  ;;  %s23_s13 = int_to_ptr.vmem [resolvable:$true] %s22_s13  ;;  %s40_s16 = int_to_ptr.hbm [resolvable:$true] %s39_s16 }
   0x4   :  { %s252_s17 = smov 128   ;;  %s253_s18 = smov 8  }
   0x5   :  { %28 = dma.hbm_to_vmem [thread:$0]  %s21_s11, 256, %s23_s13, [#allocation3], %s252_s17, %s252_s17, %s253_s18  }
   0x6   :  { %s254_s19 = smov [#allocation5]  }
   0x7   :  { %s41_s20 = sshll.u32 %s254_s19, 4  ;;  %s42_s20 = int_to_ptr.vmem [resolvable:$true] %s41_s20 }
   0x8   :  { %47 = dma.hbm_to_vmem [thread:$0]  %s40_s16, 256, %s42_s20, [#allocation6], %s252_s17, %s252_s17, %s253_s18  }
   0x9   :  { %245 = dma.done.wait [#allocation3], 256  }
   0xa   :  { %246 = vsyncadd [#allocation3], 4294967040 }
   0xb   :  { %247 = dma.done.wait [#allocation6], 256  }
   0xc   :  { %248 = vsyncadd [#allocation6], 4294967040  ;;  %v71_v0 = vld [vmem:[#allocation2] sm:$0xff]  ;;  %v73_v1 = vld [vmem:[#allocation5] sm:$0xff]  ;;  %s255_s0 = smov [#allocation7]   ;;  %s145_s23 = sshll.u32 %s291_s2, 4  ;;  %s146_s23 = int_to_ptr.hbm [resolvable:$true] %s145_s23 }
   0xd   :  { %v72_v2 = vld [vmem:[#allocation2 + $0x8] sm:$0xff]  ;;  %v75_v3 = vsub.f32 %v71_v0, %v73_v1  ;;  %v74_v4 = vld [vmem:[#allocation5 + $0x8] sm:$0xff]  ;;  %s143_s1 = sshll.u32 %s255_s0, 4  ;;  %s144_s1 = int_to_ptr.vmem [resolvable:$true] %s143_s1 }
   0xe   :  { %v76_v5 = vsub.f32 %v72_v2, %v74_v4 }
   0xf   :  { %v77_v6 = vmul.f32 %v75_v3, %v75_v3 }
  0x10   :  { %v78_v7 = vmul.f32 %v76_v5, %v76_v5 }
  0x11   :  { %v79_v8 = vadd.f32 1e-12, %v77_v6 }
  0x12   :  { %v80_v9 = vadd.f32 1e-12, %v78_v7 }
  0x13   :  { %169 = vrsqrt.f32 %v79_v8  ;;  %vm88_vm0 = vcmp.eq.f32.partialorder %v79_v8, inf  ;;  %v91_v21 = vand.u32 2147483648, %v79_v8  ;;  %vm90_vm1 = vcmp.eq.f32.partialorder %v79_v8, 0.0 }
  0x14   :  { %171 = vrsqrt.f32 %v80_v9  ;;  %vm100_vm2 = vcmp.eq.f32.partialorder %v80_v9, inf  ;;  %v103_v24 = vand.u32 2147483648, %v80_v9  ;;  %vm102_vm3 = vcmp.eq.f32.partialorder %v80_v9, 0.0 }
  0x19   :  { %v170_v10 = vpop.eup %169 }
  0x1a   :  { %v172_v11 = vpop.eup %171  ;;  %v82_v12 = vmul.f32 %v170_v10, %v79_v8 }
  0x1b   :  { %v94_v13 = vmul.f32 %v172_v11, %v80_v9 }
  0x1c   :  { %v83_v14 = vmul.f32 %v170_v10, %v82_v12 }
  0x1d   :  { %v95_v15 = vmul.f32 %v172_v11, %v94_v13 }
  0x1e   :  { %v84_v16 = vmul.f32 0.5, %v83_v14 }
  0x1f   :  { %v96_v17 = vmul.f32 0.5, %v95_v15 }
  0x20   :  { %v85_v18 = vsub.f32 1.5, %v84_v16 }
  0x21   :  { %v97_v19 = vsub.f32 1.5, %v96_v17 }
  0x22   :  { %v86_v20 = vmul.f32 %v170_v10, %v85_v18 }
  0x23   :  { %v98_v22 = vmul.f32 %v172_v11, %v97_v19 }
  0x24   :  { %v87_v23 = vmul.f32 %v86_v20, %v79_v8 }
  0x25   :  { %v99_v25 = vmul.f32 %v98_v22, %v80_v9 }
  0x26   :  { %v89_v26 = vsel %vm88_vm0, %v79_v8, %v87_v23 }
  0x27   :  { %v92_v27 = vsel %vm90_vm1, %v91_v21, %v89_v26  ;;  %v101_v28 = vsel %vm100_vm2, %v80_v9, %v99_v25 }
  0x28   :  { %v104_v29 = vsel %vm102_vm3, %v103_v24, %v101_v28  ;;  %137 = vst [vmem:[#allocation7] sm:$0xff] %v92_v27 }
  0x29   :  { %138 = vst [vmem:[#allocation7 + $0x8] sm:$0xff] %v104_v29 }
  0x2a   :  { %151 = dma.vmem_to_hbm [thread:$0]  %s144_s1, 256, %s146_s23, [#allocation4], %s252_s17, %s252_s17, %s253_s18  }
  0x2b   :  { %249 = dma.done.wait [#allocation4], 256  }
  0x2c   :  { %250 = vsyncadd [#allocation4], 4294967040 }
  0x2d   :  { %156 = vsyncpa [#allocation3], 1 }
  0x2e   :  { %157 = vsyncpa [#allocation6], 1 }
  0x2f   :  { %158 = vsyncpa [#allocation4], 1 }

</bundles_post_ra>
